<compile_context>
chip_gen: v7x
topology: tpu7x:2x2x1
jax: 0.10.0
libtpu: 0.0.40
codegen_flags: <defaults>
</compile_context>

<pallas_src>
import functools

import jax
import jax.numpy as jnp
from jax.experimental import pallas as pl
from jax.experimental.pallas import tpu as pltpu


_FULL_L_MAX = 8192      # reduce L in a single block (no reduction grid axis) up to this
_SPLIT_L_TILE = 4096    # lane-dense L tile when the reduction must be split
_MAX_BLOCK_ROWS = 512   # cap on rows per block (vreg pressure / unrolled-code sanity)
_SUB_ROWS = 128         # in-kernel row sub-tile: keeps the live f32 accumulator at 16 vregs


def _device_block_budget():
    """(per-input-block byte budget, TensorCores per chip), by TPU generation."""
    kind = ""
    try:
        kind = jax.devices()[0].device_kind.lower()
    except Exception:
        pass
    if "v5 lite" in kind or "v5e" in kind or "v5lite" in kind:
        return 6 << 20, 1           # 16 MiB scoped-VMEM default -> stay modest
    if "v6" in kind:
        return 12 << 20, 1          # 128 MiB physical VMEM, 1.4 TB/s HBM
    if "v7" in kind or "7x" in kind:
        return 10 << 20, 2          # only 64 MiB physical VMEM, 2 TensorCores
    return 8 << 20, 1


def _choose_tiles(r, l, itemsize, budget, n_tc):
    # Sublane-packing alignment: f32 -> 8 rows, bf16 -> 16, int8/fp8 -> 32.
    align = 8 * max(1, 4 // itemsize)
    tl = l if l <= _FULL_L_MAX else _SPLIT_L_TILE
    rows = max(align, budget // (tl * itemsize))
    rows = max(align, min(_MAX_BLOCK_ROWS, (rows // align) * align))
    if r <= rows:
        tr = r
        # Multi-TensorCore chips (v7x): ensure >= 2 row tiles so the "parallel"
        # R axis can shard across both cores, when there is enough work.
        if n_tc >= 2 and r >= 2 * align and r * l * itemsize >= (2 << 20):
            tr = align * pl.cdiv(pl.cdiv(r, 2), align)
    else:
        tr = rows
    return tr, tl


def _row_mean_kernel(x_ref, o_ref, acc_ref, *, l_total, l_tile, row_tile):
    li = pl.program_id(1)
    last_li = pl.num_programs(1) - 1
    multi_step = l_total > l_tile            # static: is L split across grid steps?
    tail_cols = l_total % l_tile             # valid columns in the last L tile (0 -> full)
    last_cols = tail_cols if tail_cols else l_tile
    inv_l = 1.0 / float(l_total)

    def partial_sums(r0, rows, ncols):
        """Sum columns [0, ncols) of rows [r0, r0+rows) on the VPU.

        Returns ((rows, 128) f32 lane-wise partial sums,
                 (rows, 1) f32 sum of the sub-128 column tail or None).
        Only static, 128-aligned slices are read, so no masking is needed and
        garbage pad columns of a partial last tile are never touched.
        """
        nfull = ncols // 128
        rem = ncols % 128
        acc = jnp.zeros((rows, 128), jnp.float32)
        for k in range(nfull):
            acc = acc + x_ref[r0:r0 + rows, k * 128:(k + 1) * 128].astype(jnp.float32)
        extra = None
        if rem:
            tail = x_ref[r0:r0 + rows, nfull * 128:nfull * 128 + rem].astype(jnp.float32)
            extra = jnp.sum(tail, axis=-1, keepdims=True)
        return acc, extra

    if multi_step:
        @pl.when(li == 0)
        def _init():
            acc_ref[...] = jnp.zeros_like(acc_ref)

        @pl.when(li < last_li)
        def _interior():
            # Interior L tiles are fully valid and a multiple of 128 wide.
            for r0 in range(0, row_tile, _SUB_ROWS):
                rows = min(_SUB_ROWS, row_tile - r0)
                acc, _ = partial_sums(r0, rows, l_tile)
                acc_ref[r0:r0 + rows, :] += acc

    def _finalize():
        for r0 in range(0, row_tile, _SUB_ROWS):
            rows = min(_SUB_ROWS, row_tile - r0)
            acc, extra = partial_sums(r0, rows, last_cols)
            if multi_step:
                acc = acc + acc_ref[r0:r0 + rows, :]
            # The only cross-lane (XLU) reduce: (rows, 128) -> (rows, 1).
            row_sum = jnp.sum(acc, axis=-1, keepdims=True)
            if extra is not None:
                row_sum = row_sum + extra
            o_ref[r0:r0 + rows, :] = (row_sum * inv_l).astype(o_ref.dtype)

    if multi_step:
        pl.when(li == last_li)(_finalize)
    else:
        _finalize()


def cumulative_global_pooling(x: jax.Array) -> jax.Array:
    """Pallas TPU equivalent of torch.mean(x, dim=2) for x of shape (N, C, L)."""
    assert x.ndim == 3, "expected (N, C, L) input"
    # TODO(synk): rank>3 inputs (mean over dim=2 only) are not handled here.
    n, c, l = x.shape
    r = n * c
    x2 = x.reshape(r, l)                     # free reshape: rows->sublanes, L->lanes

    itemsize = jnp.dtype(x.dtype).itemsize
    # torch.mean promotes integer inputs to floating point.
    out_dtype = x.dtype if jnp.issubdtype(x.dtype, jnp.floating) else jnp.float32

    budget, n_tc = _device_block_budget()
    tr, tl = _choose_tiles(r, l, itemsize, budget, n_tc)
    grid = (pl.cdiv(r, tr), pl.cdiv(l, tl))

    in_block_bytes = tr * tl * itemsize
    scratch_bytes = tr * 128 * 4
    vmem_limit = min(48 << 20,
                     max(16 << 20, 2 * in_block_bytes + scratch_bytes + (4 << 20)))

    kernel = functools.partial(_row_mean_kernel, l_total=l, l_tile=tl, row_tile=tr)

    # TODO(synk): output stays (R, 1) (narrow stores); a lane-dense (1, R) layout
    # would need an in-kernel (tr,1)->(1,tr) relayout for a marginal win.
    out2 = pl.pallas_call(
        kernel,
        out_shape=jax.ShapeDtypeStruct((r, 1), out_dtype),
        grid_spec=pltpu.PrefetchScalarGridSpec(
            num_scalar_prefetch=0,
            grid=grid,
            in_specs=[pl.BlockSpec((tr, tl), lambda ri, li: (ri, li))],
            out_specs=pl.BlockSpec((tr, 1), lambda ri, li: (ri, 0)),
            scratch_shapes=[pltpu.VMEM((tr, 128), jnp.float32)],
        ),
        compiler_params=pltpu.CompilerParams(
            dimension_semantics=("parallel", "arbitrary"),
            vmem_limit_bytes=vmem_limit,
        ),
        cost_estimate=pl.CostEstimate(
            flops=r * l,
            transcendentals=0,
            bytes_accessed=r * l * itemsize + r * jnp.dtype(out_dtype).itemsize,
        ),
    )(x2)

    return out2.reshape(n, c)


if __name__ == "__main__":
    key = jax.random.PRNGKey(0)

    # Small (N, C, L) case matching the module's convention.
    x = jax.random.normal(key, (2, 4, 16), dtype=jnp.float32)
    out = cumulative_global_pooling(x)
    jax.block_until_ready(out)
    ref = jnp.mean(x, axis=2)
    assert out.shape == (2, 4), out.shape
    assert out.dtype == x.dtype
    assert jnp.allclose(out, ref, rtol=1e-6, atol=1e-6)

    # Full-L path with a sub-128 lane tail (L % 128 != 0).
    x2 = jax.random.normal(jax.random.PRNGKey(1), (2, 16, 3000), dtype=jnp.float32)
    o2 = cumulative_global_pooling(x2)
    jax.block_until_ready(o2)
    assert jnp.allclose(o2, jnp.mean(x2, axis=2), rtol=1e-5, atol=1e-5)

    # Split-L path: L > 8192, accumulation across L grid steps, partial last tile.
    x3 = jax.random.normal(jax.random.PRNGKey(2), (4, 8, 20000), dtype=jnp.float32)
    o3 = cumulative_global_pooling(x3)
    jax.block_until_ready(o3)
    assert jnp.allclose(o3, jnp.mean(x3, axis=2), rtol=1e-5, atol=1e-5)

    # R-tiling path (multiple row tiles) with a packed (bf16) dtype.
    x4 = jax.random.normal(jax.random.PRNGKey(3), (8, 256, 1024), dtype=jnp.bfloat16)
    o4 = cumulative_global_pooling(x4)
    jax.block_until_ready(o4)
    ref4 = jnp.mean(x4.astype(jnp.float32), axis=2)
    assert o4.dtype == jnp.bfloat16
    assert jnp.allclose(o4.astype(jnp.float32), ref4, rtol=2e-2, atol=2e-2)

    print("KERNEL_OK")
</pallas_src>

<mosaic_0001>
module attributes {stable_mosaic.version = 11 : i64} {
  func.func @_row_mean_kernel(%arg0: i32, %arg1: i32, %arg2: memref<8x16xf32, #tpu.memory_space<vmem>>, %arg3: memref<8x1xf32, #tpu.memory_space<vmem>>, %arg4: memref<8x128xf32, #tpu.memory_space<vmem>>) attributes {dimension_semantics = [#tpu.dimension_semantics<parallel>, #tpu.dimension_semantics<arbitrary>], iteration_bounds = array<i64: 1, 1>, scalar_prefetch = 0 : i64, scratch_operands = 1 : i64, tpu.core_type = #tpu.core_type<tc>, window_params = [{transform_indices = @transform_0, window_bounds = array<i64: 8, 16>}, {transform_indices = @transform_1, window_bounds = array<i64: 8, 1>}]} {
    %cst = arith.constant 0.000000e+00 : f32
    %0 = vector.broadcast %cst : f32 to vector<8x128xf32>
    %c0 = arith.constant 0 : index
    %c0_0 = arith.constant 0 : index
    %1 = vector.load %arg2[%c0, %c0_0] : memref<8x16xf32, #tpu.memory_space<vmem>>, vector<8x16xf32>
    %cst_1 = arith.constant dense<0.000000e+00> : vector<8xf32>
    %2 = vector.multi_reduction <add>, %1, %cst_1 [1] : vector<8x16xf32> to vector<8xf32>
    %3 = vector.shape_cast %2 : vector<8xf32> to vector<8x1xf32>
    %cst_2 = arith.constant dense<0.000000e+00> : vector<8xf32>
    %4 = vector.multi_reduction <add>, %0, %cst_2 [1] : vector<8x128xf32> to vector<8xf32>
    %5 = vector.shape_cast %4 : vector<8xf32> to vector<8x1xf32>
    %6 = arith.addf %5, %3 : vector<8x1xf32>
    %cst_3 = arith.constant 6.250000e-02 : f32
    %7 = vector.broadcast %cst_3 : f32 to vector<8x1xf32>
    %8 = arith.mulf %6, %7 : vector<8x1xf32>
    %c0_4 = arith.constant 0 : index
    %c0_5 = arith.constant 0 : index
    %9 = vector.load %arg3[%c0_4, %c0_5] : memref<8x1xf32, #tpu.memory_space<vmem>>, vector<8x1xf32>
    tpu.vector_store %arg3[%c0_4, %c0_5], %8 {strides = array<i32>} : memref<8x1xf32, #tpu.memory_space<vmem>>, vector<8x1xf32>,
    return
  }
  func.func @transform_0(%arg0: i32, %arg1: i32) -> (i32, i32) {
    %c0_i32 = arith.constant 0 : i32
    return %arg0, %arg1 : i32, i32
  }
  func.func @transform_1(%arg0: i32, %arg1: i32) -> (i32, i32) {
    %c0_i32 = arith.constant 0 : i32
    %c0_i32_0 = arith.constant 0 : i32
    return %arg0, %c0_i32 : i32, i32
  }
}

</mosaic_0001>

<bundles_post_ra>
// kernel: tpu_custom_call.1
= control target key start
LH: loop header
LB: loop body
LE: loop exit
PB: predicated region body
PF: predicated region fallthrough
CT: control target
= control target key end

     0   :  { %6 = vsyncpa [#allocation4], 0  ;;  %s62_s6 = smov [#allocation3]   ;;  %s89_s0 = inlined_call_operand.hbm [shape: f32[8,16], index: 0, kind: input, shape index: {}]   ;;  %s90_s1 = inlined_call_operand.vmem [shape: f32[8,1], index: 1, kind: output, shape index: {}]  }
   0x1   :  { %s13_s7 = sshll.u32 %s62_s6, 4  ;;  %s38_s10 = scalar_lea.hbm %s89_s0, 128  ;;  %s14_s7 = int_to_ptr.vmem [resolvable:$true] %s13_s7 }
   0x2   :  { %p39_p0 = scmp.ne.s32.totalorder %s89_s0, %s38_s10  ;;  %p42_p1 = scmp.lt.u32.totalorder %s38_s10, %s89_s0 }
   0x4   :  { %p44_p2 = pnand %p42_p1, %p39_p0 }
   0x6   :  { %47 = shalt.err (!%p44_p2)
}
   0x7   :  { %s48_s15 = scalar_lea.vmem %s14_s7, 128  ;;  %p53_p4 = scmp.lt.s32.totalorder %s14_s7, %s14_s7 }
   0x8   :  { %p49_p3 = scmp.ne.s32.totalorder %s14_s7, %s48_s15  ;;  %p54_p5 = scmp.lt.s32.totalorder %s48_s15, %s48_s15 }
   0xa   :  { %p55_p6 = por %p54_p5, %p53_p4 }
   0xc   :  { %p56_p7 = pnand %p55_p6, %p49_p3 }
   0xe   :  { %59 = shalt.err (!%p56_p7)
}
   0xf   :  { %16 = dma.hbm_to_vmem [thread:$0]  %s89_s0, 128, %s14_s7, [#allocation4]  }
  0x10   :  { %60 = dma.done.wait [#allocation4], 128  }
  0x11   :  { %61 = vsyncadd [#allocation4], 4294967168  ;;  %vm21_vm0 = vcmask 130048   ;;  %v20_v0 = vld [vmem:[#allocation3] sm:$0xff]  ;;  %v63_v2 = vmov 0.0   ;;  %vm29_vm1 = vcmask 7168  }
  0x12   :  { %v22_v1 = vsel %vm21_vm0, %v20_v0, 0.0 }
  0x13   :  { %23 = vadd.xlane.f32.xlu0 %v22_v1 }
  0x17   :  { %25 = vadd.xlane.f32.xlu0 %v63_v2 }
  0xa0   :  { %v24_v3 = vpop.xlane.xlu0 %23 }
  0xa4   :  { %v26_v4 = vpop.xlane.xlu0 %25 }
  0xa5   :  { %v27_v5 = vadd.f32 %v26_v4, %v24_v3 }
  0xa7   :  { %v28_v6 = vmul.f32 0.0625, %v27_v5 }
  0xa9   :  { %30 = vst.msk [vmem:[%s90_s1] sm:$0xff] %vm29_vm1, %v28_v6 }
  0xaa   :  { %35 = vsyncpa [#allocation4], 1 }

</bundles_post_ra>
